<compile_context>
chip_gen: v6e
topology: v6e:2x2x1
jax: 0.10.0
libtpu: 0.0.40
codegen_flags: <defaults>
</compile_context>

<pallas_src>
import functools

import jax
import jax.numpy as jnp
from jax import lax
from jax.experimental import pallas as pl
from jax.experimental.pallas import tpu as pltpu

EPS = 1e-5


def _linear_tile(x_ref, w_ref):
    """y[b, o, n] = sum_c w[o, c] * x[b, c, n] for one (Bt, Cin, N) tile, f32 acc."""
    bt = x_ref.shape[0]
    # Broadcast w across the batch tile in vregs (tiny) and use the documented
    # batched-matmul einsum form ('bqk,bkd->bqd' pattern) -> MXU, f32 accumulate.
    w_b = jnp.broadcast_to(w_ref[...][None], (bt,) + w_ref.shape)    # (Bt, Cout, Cin)
    return jnp.einsum("boc,bcn->bon", w_b, x_ref[...],
                      preferred_element_type=jnp.float32)            # (Bt, Cout, N)


def _stats_kernel(x_ref, w_ref, sum_ref, ssq_ref):
    """Phase 1: accumulate per-channel sum / sum-of-squares of y over row tiles."""
    @pl.when(pl.program_id(1) == 0)
    def _():
        sum_ref[...] = jnp.zeros_like(sum_ref)
        ssq_ref[...] = jnp.zeros_like(ssq_ref)

    y = _linear_tile(x_ref, w_ref)                                   # (Bt, Cout, N)
    s = jnp.sum(jnp.sum(y, axis=2, keepdims=True), axis=0)           # (Cout, 1)
    q = jnp.sum(jnp.sum(y * y, axis=2, keepdims=True), axis=0)       # (Cout, 1)
    sum_ref[...] += s[None]
    ssq_ref[...] += q[None]


def _apply_kernel(inv_r, x_ref, w_ref, sum_ref, ssq_ref, gamma_ref, beta_ref, o_ref):
    """Phase 2: recompute y (tiny K) and apply the folded BN affine + ReLU."""
    s = jnp.sum(sum_ref[...], axis=0)                 # (Cout, 1): combine core partials
    q = jnp.sum(ssq_ref[...], axis=0)
    mean = s * inv_r                                  # inv_r is a trace-time constant
    var = jnp.maximum(q * inv_r - mean * mean, 0.0)   # one-pass variance, clamped
    scale = gamma_ref[...] * lax.rsqrt(var + EPS)     # EUP rsqrt on a (Cout,1) vector
    shift = beta_ref[...] - mean * scale

    y = _linear_tile(x_ref, w_ref)                    # (Bt, Cout, N), f32
    out = y * scale[None] + shift[None]
    o_ref[...] = jnp.maximum(out, 0.0).astype(o_ref.dtype)


def linlayer_forward(x, w, b, gamma, beta, *, tile_rows=4096):
    """x: (B, Cin, N); w: (Cout, Cin); b/gamma/beta: (Cout,). Returns (B, Cout, N)."""
    del b  # Linear bias cancels exactly under training-mode BatchNorm (see header).
    # TODO(synk): BatchNorm running_mean/running_var updates (stateful side effect
    # of nn.BatchNorm1d in training mode) are not produced; only the forward value.
    B, Cin, N = x.shape
    Cout = w.shape[0]
    R = B * N

    # Row tile = Bt whole batch elements (Bt*N rows). Largest divisor of B whose
    # row count stays <= tile_rows: every block is in-bounds (exact BN stats, no
    # masking) while amortising the per-grid-step overhead.
    bt_cap = max(1, min(B, tile_rows // max(N, 1)))
    bt = 1
    for d in range(bt_cap, 0, -1):
        if B % d == 0:
            bt = d
            break
    n_tiles = B // bt

    # v7x megacore: split the serial stats accumulation across 2 TensorCores when
    # the tile count divides evenly; each core owns its own partial-sum block.
    n_stat_cores = 2 if (n_tiles % 2 == 0) else 1
    tiles_per_core = n_tiles // n_stat_cores

    w = w.astype(x.dtype)                # native-dtype I/O; MXU accumulates in f32
    gamma2 = jnp.asarray(gamma, jnp.float32).reshape(Cout, 1)
    beta2 = jnp.asarray(beta, jnp.float32).reshape(Cout, 1)

    itemsize = x.dtype.itemsize
    flops_mm = 2 * B * N * Cin * Cout
    bytes_x = B * Cin * N * itemsize
    bytes_w = Cout * Cin * itemsize
    bytes_out = B * Cout * N * itemsize

    # ---- Phase 1: per-channel sum / sum-of-squares (accumulators stay resident) ----
    x_stats_spec = pl.BlockSpec((bt, Cin, N),
                                lambda c, i: (c * tiles_per_core + i, 0, 0))
    w_stats_spec = pl.BlockSpec((Cout, Cin), lambda c, i: (0, 0))
    stat_out_spec = pl.BlockSpec((1, Cout, 1), lambda c, i: (c, 0, 0))

    part_sum, part_ssq = pl.pallas_call(
        _stats_kernel,
        grid=(n_stat_cores, tiles_per_core),
        in_specs=[x_stats_spec, w_stats_spec],
        out_specs=(stat_out_spec, stat_out_spec),
        out_shape=(
            jax.ShapeDtypeStruct((n_stat_cores, Cout, 1), jnp.float32),
            jax.ShapeDtypeStruct((n_stat_cores, Cout, 1), jnp.float32),
        ),
        compiler_params=pltpu.CompilerParams(
            dimension_semantics=("parallel", "arbitrary")),
        cost_estimate=pl.CostEstimate(
            flops=flops_mm + 3 * B * N * Cout,
            transcendentals=0,
            bytes_accessed=bytes_x + n_tiles * bytes_w + 8 * n_stat_cores * Cout),
    )(x, w)

    # ---- Phase 2: recompute y, fold BN into scale/shift, ReLU, write (B, Cout, N) ----
    inv_r = 1.0 / R   # divide by the real row count; baked into the kernel (static)
    x_spec = pl.BlockSpec((bt, Cin, N), lambda i: (i, 0, 0))
    w_spec = pl.BlockSpec((Cout, Cin), lambda i: (0, 0))
    stat_in_spec = pl.BlockSpec((n_stat_cores, Cout, 1), lambda i: (0, 0, 0))
    vec_spec = pl.BlockSpec((Cout, 1), lambda i: (0, 0))

    out = pl.pallas_call(
        functools.partial(_apply_kernel, inv_r),
        grid=(n_tiles,),
        in_specs=[x_spec, w_spec, stat_in_spec, stat_in_spec, vec_spec, vec_spec],
        out_specs=pl.BlockSpec((bt, Cout, N), lambda i: (i, 0, 0)),
        out_shape=jax.ShapeDtypeStruct((B, Cout, N), x.dtype),
        compiler_params=pltpu.CompilerParams(dimension_semantics=("parallel",)),
        cost_estimate=pl.CostEstimate(
            flops=flops_mm + 4 * B * N * Cout,
            transcendentals=n_tiles * Cout,
            bytes_accessed=bytes_x + n_tiles * bytes_w + bytes_out),
    )(x, w, part_sum, part_ssq, gamma2, beta2)

    return out


def linlayer_reference(x, w, b, gamma, beta):
    y = jnp.einsum("oc,bcn->bon", w, x) + b[:, None]
    mean = jnp.mean(y, axis=(0, 2), keepdims=True)
    var = jnp.var(y, axis=(0, 2), keepdims=True)
    y_hat = (y - mean) / jnp.sqrt(var + EPS)
    out = gamma[:, None] * y_hat + beta[:, None]
    return jnp.maximum(out, 0.0)


if __name__ == "__main__":
    # Small shapes consistent with the module: batch=2, in_dim=4, seq(N)=16, out_dim=32.
    B, Cin, N, Cout = 2, 4, 16, 32

    key = jax.random.PRNGKey(0)
    kx, kw, kb = jax.random.split(key, 3)

    x = jax.random.normal(kx, (B, Cin, N), dtype=jnp.float32)

    # nn.Linear-style uniform(-1/sqrt(fan_in), 1/sqrt(fan_in)) init.
    bound = 1.0 / float(Cin) ** 0.5
    w = jax.random.uniform(kw, (Cout, Cin), jnp.float32, minval=-bound, maxval=bound)
    b = jax.random.uniform(kb, (Cout,), jnp.float32, minval=-bound, maxval=bound)
    # BatchNorm1d default init: weight=1, bias=0.
    gamma = jnp.ones((Cout,), jnp.float32)
    beta = jnp.zeros((Cout,), jnp.float32)

    out = jax.block_until_ready(linlayer_forward(x, w, b, gamma, beta))

    ref = linlayer_reference(x, w, b, gamma, beta)
    assert out.shape == (B, Cout, N)
    assert jnp.allclose(out, ref, atol=1e-4, rtol=1e-4), "mismatch vs JAX reference"

    print("KERNEL_OK")
</pallas_src>

<mosaic_0001>
module attributes {stable_mosaic.version = 11 : i64} {
  func.func @_stats_kernel(%arg0: i32, %arg1: i32, %arg2: memref<2x4x16xf32, #tpu.memory_space<vmem>>, %arg3: memref<32x4xf32, #tpu.memory_space<vmem>>, %arg4: memref<1x32x1xf32, #tpu.memory_space<vmem>>, %arg5: memref<1x32x1xf32, #tpu.memory_space<vmem>>) attributes {dimension_semantics = [#tpu.dimension_semantics<parallel>, #tpu.dimension_semantics<arbitrary>], iteration_bounds = array<i64: 1, 1>, scalar_prefetch = 0 : i64, scratch_operands = 0 : i64, tpu.core_type = #tpu.core_type<tc>, window_params = [{transform_indices = @transform_0, window_bounds = array<i64: 2, 4, 16>}, {pipeline_mode = #tpu.pipeline_mode<synchronous>, transform_indices = @transform_1, window_bounds = array<i64: 32, 4>}, {transform_indices = @transform_2, window_bounds = array<i64: 1, 32, 1>}, {transform_indices = @transform_3, window_bounds = array<i64: 1, 32, 1>}]} {
    %c0_i32 = arith.constant 0 : i32
    %0 = arith.cmpi eq, %arg1, %c0_i32 : i32
    %1 = arith.extui %0 : i1 to i32
    %c0_i32_0 = arith.constant 0 : i32
    %2 = arith.cmpi ne, %1, %c0_i32_0 : i32
    scf.if %2 {
      %cst_21 = arith.constant 0.000000e+00 : f32
      %24 = vector.broadcast %cst_21 : f32 to vector<1x32x1xf32>
      %c0_22 = arith.constant 0 : index
      %c0_23 = arith.constant 0 : index
      %c0_24 = arith.constant 0 : index
      %25 = vector.load %arg4[%c0_22, %c0_23, %c0_24] : memref<1x32x1xf32, #tpu.memory_space<vmem>>, vector<1x32x1xf32>
      tpu.vector_store %arg4[%c0_22, %c0_23, %c0_24], %24 {strides = array<i32>} : memref<1x32x1xf32, #tpu.memory_space<vmem>>, vector<1x32x1xf32>,
      %cst_25 = arith.constant 0.000000e+00 : f32
      %26 = vector.broadcast %cst_25 : f32 to vector<1x32x1xf32>
      %c0_26 = arith.constant 0 : index
      %c0_27 = arith.constant 0 : index
      %c0_28 = arith.constant 0 : index
      %27 = vector.load %arg5[%c0_26, %c0_27, %c0_28] : memref<1x32x1xf32, #tpu.memory_space<vmem>>, vector<1x32x1xf32>
      tpu.vector_store %arg5[%c0_26, %c0_27, %c0_28], %26 {strides = array<i32>} : memref<1x32x1xf32, #tpu.memory_space<vmem>>, vector<1x32x1xf32>,
    } else {
    }
    %c0 = arith.constant 0 : index
    %c0_1 = arith.constant 0 : index
    %3 = vector.load %arg3[%c0, %c0_1] : memref<32x4xf32, #tpu.memory_space<vmem>>, vector<32x4xf32>
    %4 = vector.shape_cast %3 : vector<32x4xf32> to vector<1x32x4xf32>
    %5 = vector.shape_cast %4 : vector<1x32x4xf32> to vector<1x32x4xf32>
    %6 = vector.broadcast %5 : vector<1x32x4xf32> to vector<2x32x4xf32>
    %c0_2 = arith.constant 0 : index
    %c0_3 = arith.constant 0 : index
    %c0_4 = arith.constant 0 : index
    %7 = vector.load %arg2[%c0_2, %c0_3, %c0_4] : memref<2x4x16xf32, #tpu.memory_space<vmem>>, vector<2x4x16xf32>
    "tpu.trace_start"() <{level = 10 : i32, message = "boc,bcn->bon"}> : () -> ()
    %cst = arith.constant dense<0.000000e+00> : vector<2x32x16xf32>
    %8 = tpu.matmul %6, %7, %cst {dimension_numbers = #tpu.dot_dimension_numbers<[2], [1], [1], [2], [0, 0, 0, 1, 1, 2], [0], [0]>} : vector<2x32x4xf32>, vector<2x4x16xf32>, vector<2x32x16xf32> -> vector<2x32x16xf32>
    "tpu.trace_stop"() : () -> ()
    %cst_5 = arith.constant dense<0.000000e+00> : vector<2x32xf32>
    %9 = vector.multi_reduction <add>, %8, %cst_5 [2] : vector<2x32x16xf32> to vector<2x32xf32>
    %10 = vector.shape_cast %9 : vector<2x32xf32> to vector<2x32x1xf32>
    %cst_6 = arith.constant dense<0.000000e+00> : vector<32x1xf32>
    %11 = vector.multi_reduction <add>, %10, %cst_6 [0] : vector<2x32x1xf32> to vector<32x1xf32>
    %12 = arith.mulf %8, %8 : vector<2x32x16xf32>
    %cst_7 = arith.constant dense<0.000000e+00> : vector<2x32xf32>
    %13 = vector.multi_reduction <add>, %12, %cst_7 [2] : vector<2x32x16xf32> to vector<2x32xf32>
    %14 = vector.shape_cast %13 : vector<2x32xf32> to vector<2x32x1xf32>
    %cst_8 = arith.constant dense<0.000000e+00> : vector<32x1xf32>
    %15 = vector.multi_reduction <add>, %14, %cst_8 [0] : vector<2x32x1xf32> to vector<32x1xf32>
    %c0_9 = arith.constant 0 : index
    %c0_10 = arith.constant 0 : index
    %c0_11 = arith.constant 0 : index
    %16 = vector.load %arg4[%c0_9, %c0_10, %c0_11] : memref<1x32x1xf32, #tpu.memory_space<vmem>>, vector<1x32x1xf32>
    %17 = vector.shape_cast %11 : vector<32x1xf32> to vector<1x32x1xf32>
    %18 = arith.addf %16, %17 : vector<1x32x1xf32>
    %c0_12 = arith.constant 0 : index
    %c0_13 = arith.constant 0 : index
    %c0_14 = arith.constant 0 : index
    %19 = vector.load %arg4[%c0_12, %c0_13, %c0_14] : memref<1x32x1xf32, #tpu.memory_space<vmem>>, vector<1x32x1xf32>
    tpu.vector_store %arg4[%c0_12, %c0_13, %c0_14], %18 {strides = array<i32>} : memref<1x32x1xf32, #tpu.memory_space<vmem>>, vector<1x32x1xf32>,
    %c0_15 = arith.constant 0 : index
    %c0_16 = arith.constant 0 : index
    %c0_17 = arith.constant 0 : index
    %20 = vector.load %arg5[%c0_15, %c0_16, %c0_17] : memref<1x32x1xf32, #tpu.memory_space<vmem>>, vector<1x32x1xf32>
    %21 = vector.shape_cast %15 : vector<32x1xf32> to vector<1x32x1xf32>
    %22 = arith.addf %20, %21 : vector<1x32x1xf32>
    %c0_18 = arith.constant 0 : index
    %c0_19 = arith.constant 0 : index
    %c0_20 = arith.constant 0 : index
    %23 = vector.load %arg5[%c0_18, %c0_19, %c0_20] : memref<1x32x1xf32, #tpu.memory_space<vmem>>, vector<1x32x1xf32>
    tpu.vector_store %arg5[%c0_18, %c0_19, %c0_20], %22 {strides = array<i32>} : memref<1x32x1xf32, #tpu.memory_space<vmem>>, vector<1x32x1xf32>,
    return
  }
  func.func @transform_0(%arg0: i32, %arg1: i32) -> (i32, i32, i32) {
    %c1_i32 = arith.constant 1 : i32
    %0 = arith.muli %arg0, %c1_i32 : i32
    %1 = arith.addi %0, %arg1 : i32
    %c0_i32 = arith.constant 0 : i32
    %c0_i32_0 = arith.constant 0 : i32
    %c0_i32_1 = arith.constant 0 : i32
    return %1, %c0_i32, %c0_i32_0 : i32, i32, i32
  }
  func.func @transform_1(%arg0: i32, %arg1: i32) -> (i32, i32) {
    %c0_i32 = arith.constant 0 : i32
    %c0_i32_0 = arith.constant 0 : i32
    %c0_i32_1 = arith.constant 0 : i32
    return %c0_i32, %c0_i32_0 : i32, i32
  }
  func.func @transform_2(%arg0: i32, %arg1: i32) -> (i32, i32, i32) {
    %c0_i32 = arith.constant 0 : i32
    %c0_i32_0 = arith.constant 0 : i32
    %c0_i32_1 = arith.constant 0 : i32
    return %arg0, %c0_i32, %c0_i32_0 : i32, i32, i32
  }
  func.func @transform_3(%arg0: i32, %arg1: i32) -> (i32, i32, i32) {
    %c0_i32 = arith.constant 0 : i32
    %c0_i32_0 = arith.constant 0 : i32
    %c0_i32_1 = arith.constant 0 : i32
    return %arg0, %c0_i32, %c0_i32_0 : i32, i32, i32
  }
}

</mosaic_0001>

<bundles_post_ra>
// kernel: tpu_custom_call.1
= control target key start
LH: loop header
LB: loop body
LE: loop exit
PB: predicated region body
PF: predicated region fallthrough
CT: control target
= control target key end

     0   :  { %vm67_vm0 = vcmask 1043456   ;;  %vm54_vm1 = vcmask 31744   ;;  %vm244_vm2 = vcmask 130048   ;;  %vm39_vm3 = vcmask 7168   ;;  %s536_s0 = inlined_call_operand.vmem [shape: f32[2,4,16], index: 0, kind: input, shape index: {}]   ;;  %s537_s1 = inlined_call_operand.vmem [shape: f32[32,4], index: 1, kind: input, shape index: {}]   ;;  %s538_s2 = inlined_call_operand.vmem [shape: f32[1,32,1], index: 2, kind: output, shape index: {0}]   ;;  %s539_s3 = inlined_call_operand.vmem [shape: f32[1,32,1], index: 3, kind: output, shape index: {1}]  }
   0x1   :  { %v52_v0 = vld [vmem:[%s536_s0] sm:$0xf]  ;;  %v53_v1 = vld [vmem:[%s536_s0 + $0x4] sm:$0xf]  ;;  %v49_v3 = vld [vmem:[%s537_s1 + $0x8] sm:$0xff]  ;;  %v385_v16 = vmov 0.0  }
   0x2   :  { %v48_v2 = vld [vmem:[%s537_s1] sm:$0xff]  ;;  %368 = vmatprep.subr.msk.mxu0 %vm67_vm0, %v52_v0  ;;  %376 = vmatprep.subr.msk.mxu1 %vm67_vm0, %v53_v1  ;;  %v50_v4 = vld [vmem:[%s537_s1 + $0x10] sm:$0xff]  ;;  %v51_v5 = vld [vmem:[%s537_s1 + $0x18] sm:$0xff]  ;;  %41 = vst.msk [vmem:[%s538_s2 + $0x8] sm:$0xff] %vm39_vm3, %v385_v16 }
   0x3   :  { %369 = vmatpush3.msk.msra.mxu0 %vm67_vm0, %v52_v0  ;;  %370 = vmatprep.mubr.msk.f32.mxu0 %vm54_vm1, %v48_v2  ;;  %40 = vst.msk [vmem:[%s538_s2] sm:$0xff] %vm39_vm3, %v385_v16  ;;  %42 = vst.msk [vmem:[%s538_s2 + $0x10] sm:$0xff] %vm39_vm3, %v385_v16 }
   0x4   :  { %377 = vmatpush3.msk.msra.mxu1 %vm67_vm0, %v53_v1  ;;  %378 = vmatprep.mubr.msk.f32.mxu1 %vm54_vm1, %v48_v2  ;;  %43 = vst.msk [vmem:[%s538_s2 + $0x18] sm:$0xff] %vm39_vm3, %v385_v16  ;;  %45 = vst.msk [vmem:[%s539_s3 + $0x8] sm:$0xff] %vm39_vm3, %v385_v16 }
   0x5   :  { %371 = vmatmul.mubr.msk.f32.vlgmr.msra.gmra.mxu0 %vm54_vm1, %v49_v3  ;;  %379 = vmatmul.mubr.msk.f32.vlgmr.msra.gmra.mxu1 %vm54_vm1, %v49_v3  ;;  %44 = vst.msk [vmem:[%s539_s3] sm:$0xff] %vm39_vm3, %v385_v16  ;;  %46 = vst.msk [vmem:[%s539_s3 + $0x10] sm:$0xff] %vm39_vm3, %v385_v16 }
   0x6   :  { %373 = vmatprep.mubr.msk.f32.mxu0 %vm54_vm1, %v50_v4  ;;  %381 = vmatprep.mubr.msk.f32.mxu1 %vm54_vm1, %v50_v4  ;;  %47 = vst.msk [vmem:[%s539_s3 + $0x18] sm:$0xff] %vm39_vm3, %v385_v16 }
   0x9   :  { %374 = vmatmul.mubr.msk.f32.gmra.mxu0 %vm54_vm1, %v51_v5  ;;  %382 = vmatmul.mubr.msk.f32.gmra.mxu1 %vm54_vm1, %v51_v5  ;;  %v310_v40 = vld [vmem:[%s538_s2 + $0x8] sm:$0xff] }
   0xa   :  { %v309_v48 = vld [vmem:[%s538_s2] sm:$0xff]  ;;  %v311_v1 = vld [vmem:[%s538_s2 + $0x10] sm:$0xff] }
   0xb   :  { %v323_v46 = vld [vmem:[%s539_s3 + $0x8] sm:$0xff]  ;;  %v312_v58 = vld [vmem:[%s538_s2 + $0x18] sm:$0xff] }
   0xc   :  { %v322_v56 = vld [vmem:[%s539_s3] sm:$0xff] }
  0xc5   :  { %v372_v6 = vpop.f32.mrf.mxu0  ;;  %v380_v7 = vpop.f32.mrf.mxu1 }
  0xc6   :  { %v274_v8 = vmul.f32 %v372_v6, %v372_v6  ;;  %v260_v9 = vsel %vm244_vm2, %v380_v7, 0.0  ;;  %v248_v10 = vsel %vm244_vm2, %v372_v6, 0.0  ;;  %v278_v12 = vmul.f32 %v380_v7, %v380_v7  ;;  %v324_v7 = vld [vmem:[%s539_s3 + $0x10] sm:$0xff] }
  0xc7   :  { %261 = vadd.xlane.f32.xlu1 %v260_v9  ;;  %249 = vadd.xlane.f32.xlu0 %v248_v10  ;;  %v137_v11 = vpop.f32.mrf.mxu0  ;;  %v225_v15 = vpop.f32.mrf.mxu1  ;;  %v325_v9 = vld [vmem:[%s539_s3 + $0x18] sm:$0xff] }
  0xc8   :  { %v284_v13 = vsel %vm244_vm2, %v274_v8, 0.0  ;;  %v245_v14 = vsel %vm244_vm2, %v137_v11, 0.0  ;;  %v273_v17 = vmul.f32 %v137_v11, %v137_v11  ;;  %v296_v18 = vsel %vm244_vm2, %v278_v12, 0.0 }
  0xc9   :  { %v257_v19 = vsel %vm244_vm2, %v225_v15, 0.0  ;;  %v375_v20 = vpop.f32.mrf.mxu0  ;;  %v277_v22 = vmul.f32 %v225_v15, %v225_v15  ;;  %v383_v24 = vpop.f32.mrf.mxu1 }
  0xca   :  { %v254_v21 = vsel %vm244_vm2, %v375_v20, 0.0  ;;  %v281_v23 = vsel %vm244_vm2, %v273_v17, 0.0  ;;  %v266_v25 = vsel %vm244_vm2, %v383_v24, 0.0  ;;  %v276_v29 = vmul.f32 %v375_v20, %v375_v20 }
  0xcb   :  { %285 = vadd.xlane.f32.xlu1 %v284_v13  ;;  %246 = vadd.xlane.f32.xlu0 %v245_v14  ;;  %v293_v26 = vsel %vm244_vm2, %v277_v22, 0.0  ;;  %v147_v27 = vpop.f32.mrf.mxu0  ;;  %v235_v28 = vpop.f32.mrf.mxu1  ;;  %v280_v33 = vmul.f32 %v383_v24, %v383_v24 }
  0xcc   :  { %v275_v30 = vmul.f32 %v147_v27, %v147_v27  ;;  %v263_v31 = vsel %vm244_vm2, %v235_v28, 0.0  ;;  %v251_v32 = vsel %vm244_vm2, %v147_v27, 0.0  ;;  %v279_v34 = vmul.f32 %v235_v28, %v235_v28 }
  0xcd   :  { %v290_v36 = vsel %vm244_vm2, %v276_v29, 0.0  ;;  %v302_v38 = vsel %vm244_vm2, %v280_v33, 0.0 }
  0xce   :  { %v287_v35 = vsel %vm244_vm2, %v275_v30, 0.0  ;;  %v299_v37 = vsel %vm244_vm2, %v279_v34, 0.0 }
  0xcf   :  { %297 = vadd.xlane.f32.xlu1 %v296_v18  ;;  %258 = vadd.xlane.f32.xlu0 %v257_v19 }
  0xd3   :  { %282 = vadd.xlane.f32.xlu0 %v281_v23  ;;  %255 = vadd.xlane.f32.xlu1 %v254_v21 }
  0xd7   :  { %294 = vadd.xlane.f32.xlu0 %v293_v26  ;;  %267 = vadd.xlane.f32.xlu1 %v266_v25 }
  0xdb   :  { %264 = vadd.xlane.f32.xlu0 %v263_v31  ;;  %252 = vadd.xlane.f32.xlu1 %v251_v32 }
  0xdf   :  { %288 = vadd.xlane.f32.xlu0 %v287_v35  ;;  %291 = vadd.xlane.f32.xlu1 %v290_v36 }
  0xe3   :  { %300 = vadd.xlane.f32.xlu0 %v299_v37  ;;  %303 = vadd.xlane.f32.xlu1 %v302_v38 }
 0x150   :  { %v262_v39 = vpop.xlane.xlu1 %261  ;;  %v250_v41 = vpop.xlane.xlu0 %249 }
 0x151   :  { %v270_v42 = vadd.f32 %v262_v39, %v250_v41 }
 0x153   :  { %v314_v43 = vadd.f32 %v310_v40, %v270_v42 }
 0x154   :  { %v286_v44 = vpop.xlane.xlu1 %285  ;;  %v247_v45 = vpop.xlane.xlu0 %246 }
 0x155   :  { %319 = vst.msk [vmem:[%s538_s2 + $0x8] sm:$0xff] %vm39_vm3, %v314_v43 }
 0x158   :  { %v298_v47 = vpop.xlane.xlu1 %297  ;;  %v259_v49 = vpop.xlane.xlu0 %258 }
 0x159   :  { %v306_v50 = vadd.f32 %v298_v47, %v286_v44  ;;  %v269_v51 = vadd.f32 %v259_v49, %v247_v45 }
 0x15b   :  { %v327_v52 = vadd.f32 %v323_v46, %v306_v50  ;;  %v313_v53 = vadd.f32 %v309_v48, %v269_v51 }
 0x15c   :  { %v283_v54 = vpop.xlane.xlu0 %282  ;;  %v256_v55 = vpop.xlane.xlu1 %255 }
 0x15d   :  { %331 = vst.msk [vmem:[%s539_s3 + $0x8] sm:$0xff] %vm39_vm3, %v327_v52  ;;  %318 = vst.msk [vmem:[%s538_s2] sm:$0xff] %vm39_vm3, %v313_v53 }
 0x160   :  { %v295_v57 = vpop.xlane.xlu0 %294  ;;  %v268_v59 = vpop.xlane.xlu1 %267 }
 0x161   :  { %v305_v60 = vadd.f32 %v295_v57, %v283_v54  ;;  %v272_v61 = vadd.f32 %v268_v59, %v256_v55 }
 0x163   :  { %v326_v62 = vadd.f32 %v322_v56, %v305_v60  ;;  %v316_v63 = vadd.f32 %v312_v58, %v272_v61 }
 0x164   :  { %v265_v0 = vpop.xlane.xlu0 %264  ;;  %v253_v2 = vpop.xlane.xlu1 %252 }
 0x165   :  { %330 = vst.msk [vmem:[%s539_s3] sm:$0xff] %vm39_vm3, %v326_v62  ;;  %321 = vst.msk [vmem:[%s538_s2 + $0x18] sm:$0xff] %vm39_vm3, %v316_v63  ;;  %v271_v3 = vadd.f32 %v265_v0, %v253_v2 }
 0x167   :  { %v315_v4 = vadd.f32 %v311_v1, %v271_v3 }
 0x168   :  { %v289_v5 = vpop.xlane.xlu0 %288  ;;  %v292_v6 = vpop.xlane.xlu1 %291 }
 0x169   :  { %320 = vst.msk [vmem:[%s538_s2 + $0x10] sm:$0xff] %vm39_vm3, %v315_v4 }
 0x16c   :  { %v301_v8 = vpop.xlane.xlu0 %300  ;;  %v304_v10 = vpop.xlane.xlu1 %303 }
 0x16d   :  { %v307_v11 = vadd.f32 %v301_v8, %v289_v5  ;;  %v308_v12 = vadd.f32 %v304_v10, %v292_v6 }
 0x16f   :  { %v328_v13 = vadd.f32 %v324_v7, %v307_v11  ;;  %v329_v14 = vadd.f32 %v325_v9, %v308_v12 }
 0x171   :  { %332 = vst.msk [vmem:[%s539_s3 + $0x10] sm:$0xff] %vm39_vm3, %v328_v13  ;;  %333 = vst.msk [vmem:[%s539_s3 + $0x18] sm:$0xff] %vm39_vm3, %v329_v14 }

</bundles_post_ra>
